<compile_context>
chip_gen: v7x
topology: tpu7x:2x2x1
jax: 0.10.0
libtpu: 0.0.40
codegen_flags: <defaults>
</compile_context>

<pallas_src>
import functools

import jax
import jax.numpy as jnp
from jax import lax
from jax.experimental import pallas as pl
from jax.experimental.pallas import tpu as pltpu


_LN_EPS = 1e-5


def _round_up(a: int, m: int) -> int:
    return ((a + m - 1) // m) * m


def _vmem_capacity_bytes() -> int:
    """Physical VMEM per TensorCore; conservative (v7x, 64 MiB) if unknown."""
    try:
        cap = int(getattr(pltpu.get_tpu_info(), "vmem_capacity_bytes", 0))
        if cap > 0:
            return cap
    except Exception:
        pass
    return 64 * 1024 * 1024


def make_prenorm_plan(dim: int, mxu_dtype=jnp.bfloat16) -> dict:
    """Generation-aware tiling plan (depends only on `dim` and the hardware)."""
    cap = _vmem_capacity_bytes()
    small_vmem = cap <= 64 * 1024 * 1024           # v7x-like (64 MiB per TC)
    headroom = (8 if small_vmem else 16) * 1024 * 1024
    row_cap = 256 if small_vmem else 512           # row-tile cap with resident W
    w_bytes = jnp.dtype(mxu_dtype).itemsize

    dim_padded = max(128, _round_up(dim, 128))
    # Full-W residency check at the worst-case row tile for this generation:
    # W (double-buffered) + x/out double buffers + y scratch + LN f32 temps.
    ln_strip = min(row_cap, 128)
    resident_need = (2 * dim_padded * dim_padded * w_bytes
                     + 2 * row_cap * dim_padded * 4          # x blocks (<= f32)
                     + 2 * row_cap * dim_padded * 4          # out blocks (f32)
                     + row_cap * dim_padded * w_bytes        # y scratch
                     + 3 * ln_strip * dim_padded * 4         # LN f32 temps
                     + 8 * dim_padded * 4)                   # gamma/beta/bias
    if resident_need <= cap - headroom:
        return dict(dim=dim, dim_padded=dim_padded, tile_cols=dim_padded,
                    resident_w=True, vmem_cap=cap, small_vmem=small_vmem,
                    mxu_dtype=mxu_dtype)
    # Column tiling (very large dim): 256-multiple output tiles so the
    # 2x256^2 MXU on v6e/v7x is fully used (v5e's 128-wide MXU is also fine).
    dim_padded = max(256, _round_up(dim, 256))
    tile_cols = 512 if dim_padded % 512 == 0 else 256
    return dict(dim=dim, dim_padded=dim_padded, tile_cols=tile_cols,
                resident_w=False, vmem_cap=cap, small_vmem=small_vmem,
                mxu_dtype=mxu_dtype)


def prepare_prenorm_params(gamma, beta, w, bias, plan):
    """Pad + cast the parameters ONCE (hoisted out of the per-call path).

    W is pre-cast to the MXU dtype (bf16 by default) so a forward call never
    re-reads the f32 weights and writes a cast copy back to HBM.
    """
    D, Dp = plan["dim"], plan["dim_padded"]
    f32 = jnp.float32
    gp = jnp.zeros((1, Dp), f32).at[0, :D].set(gamma.astype(f32))
    bp = jnp.zeros((1, Dp), f32).at[0, :D].set(beta.astype(f32))
    wp = jnp.zeros((Dp, Dp), plan["mxu_dtype"]).at[:D, :D].set(
        w.astype(plan["mxu_dtype"]))
    biasp = jnp.zeros((1, Dp), f32).at[0, :D].set(bias.astype(f32))
    return gp, bp, wp, biasp


def _prenorm_kernel(x_ref, gamma_ref, beta_ref, w_ref, bias_ref, o_ref, y_ref,
                    *, dim: int, dim_padded: int, ln_strip: int):
    """LayerNorm over the last dim (f32 stats), then Linear on the MXU.

    Grid = (row_tiles, col_tiles) with the column axis innermost and
    'arbitrary', so j == 0 runs first for every row tile: the normalized
    activations cached in y_ref are then reused for every output-column tile.
    Do NOT reorder the grid or mark the column axis 'parallel' -- the y_ref
    scratch reuse depends on this ordering.
    """
    j = pl.program_id(1)

    @pl.when(j == 0)
    def _():
        gamma = gamma_ref[...]                     # (1, Dp) f32
        beta = beta_ref[...]
        inv_d = 1.0 / dim

        def ln_strip_fn(r0):
            x = x_ref[pl.ds(r0, ln_strip), :].astype(jnp.float32)
            if dim != dim_padded:
                lane = lax.broadcasted_iota(jnp.int32, x.shape, 1)
                valid = lane < dim
                x = jnp.where(valid, x, 0.0)
            # PyTorch LayerNorm semantics: biased variance, eps = 1e-5.
            mean = jnp.sum(x, axis=-1, keepdims=True) * inv_d
            centered = x - mean
            if dim != dim_padded:
                centered = jnp.where(valid, centered, 0.0)
            var = jnp.sum(centered * centered, axis=-1, keepdims=True) * inv_d
            y = centered * lax.rsqrt(var + _LN_EPS) * gamma + beta
            y_ref[pl.ds(r0, ln_strip), :] = y.astype(y_ref.dtype)

        n_strips = y_ref.shape[0] // ln_strip
        if n_strips == 1:
            ln_strip_fn(0)
        else:
            # Strip-wise LN bounds the f32 temporaries to a few hundred KiB.
            def body(s, carry):
                ln_strip_fn(pl.multiple_of(s * ln_strip, ln_strip))
                return carry
            lax.fori_loop(0, n_strips, body, 0, unroll=n_strips <= 8)

    # fn: Linear(dim, dim) -- bf16 operands (default), f32 accumulate on MXU.
    out = jnp.dot(y_ref[...], w_ref[...], preferred_element_type=jnp.float32)
    o_ref[...] = (out + bias_ref[...]).astype(o_ref.dtype)


def prenorm_forward(x, gamma_p, beta_p, w_p, bias_p, plan, *, tile_rows=None):
    """x: (B, S, D) in its native dtype; params from prepare_prenorm_params."""
    B, S, D = x.shape
    assert D == plan["dim"]
    Dp = plan["dim_padded"]
    tile_cols = plan["tile_cols"]
    rows = B * S
    x2d = x.reshape(rows, D)

    # Row tiling: >=4 tiles when possible (>=2 per TensorCore on megacore
    # parts so the next x block prefetch overlaps the current matmul); the cap
    # is generation / W-residency aware (larger when W is re-streamed).
    if tile_rows is None:
        row_cap = 256 if plan["small_vmem"] else (
            512 if plan["resident_w"] else 1024)
        tile_rows = min(row_cap, max(8, _round_up(-(-rows // 4), 8)))
        if tile_rows > 128:
            tile_rows = _round_up(tile_rows, 128)
    tile_rows = max(8, _round_up(tile_rows, 8))
    ln_strip = tile_rows if tile_rows <= 128 else 128
    assert tile_rows % ln_strip == 0

    rows_p = _round_up(rows, tile_rows)
    need_pad = (rows_p != rows) or (Dp != D)

    # No host-side pad/cast of x unless the shape actually requires it.
    if need_pad:
        xin = jnp.zeros((rows_p, Dp), x.dtype).at[:rows, :D].set(x2d)
    else:
        xin = x2d

    grid = (rows_p // tile_rows, Dp // tile_cols)
    n_col = grid[1]

    # Serpentine column order when column-tiled: the last W slab of row tile i
    # is the first slab of row tile i+1 (saves one slab re-fetch per row tile).
    if n_col > 1:
        def _col(i, j):
            return jnp.where(i % 2 == 1, n_col - 1 - j, j)
        w_map = lambda i, j: (0, _col(i, j))
        b_map = lambda i, j: (0, _col(i, j))
        o_map = lambda i, j: (i, _col(i, j))
    else:
        w_map = lambda i, j: (0, 0)
        b_map = lambda i, j: (0, 0)
        o_map = lambda i, j: (i, 0)

    # VMEM budget (now includes LN f32 temporaries) + generation headroom.
    x_b = x.dtype.itemsize
    o_b = x.dtype.itemsize
    w_b = jnp.dtype(plan["mxu_dtype"]).itemsize
    vmem_needed = (2 * tile_rows * Dp * x_b            # x blocks (2 bufs)
                   + 2 * tile_rows * tile_cols * o_b   # out blocks (2 bufs)
                   + 2 * Dp * tile_cols * w_b          # W slab (2 bufs)
                   + tile_rows * Dp * w_b              # y scratch
                   + 3 * ln_strip * Dp * 4             # LN f32 temporaries
                   + 8 * Dp * 4)                       # gamma/beta/bias
    headroom = (8 if plan["small_vmem"] else 16) * 1024 * 1024
    vmem_limit = int(min(max(int(vmem_needed * 1.25), 32 * 1024 * 1024),
                         plan["vmem_cap"] - headroom))

    cost = pl.CostEstimate(
        flops=2 * rows * D * D + 8 * rows * D,
        transcendentals=rows,                          # one rsqrt per row
        bytes_accessed=rows * D * (x_b + o_b) + D * D * w_b + 3 * D * 4,
    )

    kernel = functools.partial(_prenorm_kernel, dim=D, dim_padded=Dp,
                               ln_strip=ln_strip)

    out_p = pl.pallas_call(
        kernel,
        out_shape=jax.ShapeDtypeStruct((rows_p, Dp), x.dtype),
        grid_spec=pltpu.PrefetchScalarGridSpec(
            num_scalar_prefetch=0,
            grid=grid,
            in_specs=[
                pl.BlockSpec((tile_rows, Dp), lambda i, j: (i, 0)),   # x rows
                pl.BlockSpec((1, Dp), lambda i, j: (0, 0)),           # gamma
                pl.BlockSpec((1, Dp), lambda i, j: (0, 0)),           # beta
                pl.BlockSpec((Dp, tile_cols), w_map),                 # W slab
                pl.BlockSpec((1, tile_cols), b_map),                  # bias
            ],
            out_specs=pl.BlockSpec((tile_rows, tile_cols), o_map),
            scratch_shapes=[pltpu.VMEM((tile_rows, Dp), plan["mxu_dtype"])],
        ),
        compiler_params=pltpu.CompilerParams(
            # Row axis parallel (megacore). Column axis MUST stay innermost and
            # 'arbitrary' for the y_ref scratch reuse to remain correct.
            dimension_semantics=("parallel", "arbitrary"),
            vmem_limit_bytes=vmem_limit,
        ),
        cost_estimate=cost,
    )(xin, gamma_p, beta_p, w_p, bias_p)

    if need_pad:
        out_p = out_p[:rows, :D]
    return out_p.reshape(B, S, D)


def prenorm_reference(x, gamma, beta, w, bias):
    """Pure-JAX reference (f32 everywhere) for correctness checking."""
    mean = jnp.mean(x, axis=-1, keepdims=True)
    var = jnp.mean((x - mean) ** 2, axis=-1, keepdims=True)
    y = (x - mean) / jnp.sqrt(var + _LN_EPS)
    y = y * gamma + beta
    return y @ w + bias


if __name__ == "__main__":
    # Small shapes consistent with PreNorm(dim, fn) on token sequences.
    B, S, D = 2, 8, 32

    key = jax.random.PRNGKey(0)
    kx, kw, kb = jax.random.split(key, 3)

    x = jax.random.normal(kx, (B, S, D), dtype=jnp.float32)

    # LayerNorm params (PyTorch default init: gamma=1, beta=0).
    gamma = jnp.ones((D,), dtype=jnp.float32)
    beta = jnp.zeros((D,), dtype=jnp.float32)

    # fn = Linear(D, D), deterministic init in-script.
    # TODO(synk): PreNorm's `fn` is an arbitrary callable in PyTorch; only a
    # Linear(dim, dim) instantiation is fused here.
    w = jax.random.normal(kw, (D, D), dtype=jnp.float32) * 0.02
    bias = jax.random.normal(kb, (D,), dtype=jnp.float32) * 0.02

    # Generation-aware plan + one-time parameter prep (hoisted out of forward).
    plan = make_prenorm_plan(D, mxu_dtype=jnp.bfloat16)
    gamma_p, beta_p, w_p, bias_p = jax.block_until_ready(
        prepare_prenorm_params(gamma, beta, w, bias, plan))

    out = jax.block_until_ready(
        prenorm_forward(x, gamma_p, beta_p, w_p, bias_p, plan))

    ref = prenorm_reference(x, gamma, beta, w, bias)
    assert out.shape == (B, S, D)
    assert out.dtype == x.dtype
    # bf16 MXU operands (f32 accumulate) -> slightly looser tolerance.
    assert jnp.allclose(out, ref, atol=3e-2, rtol=3e-2), (
        "mismatch vs reference; max abs diff = "
        f"{float(jnp.max(jnp.abs(out - ref)))}")

    print("KERNEL_OK")
</pallas_src>

<mosaic_0001>
module attributes {stable_mosaic.version = 11 : i64} {
  func.func @_prenorm_kernel(%arg0: i32, %arg1: i32, %arg2: memref<8x128xf32, #tpu.memory_space<vmem>>, %arg3: memref<1x128xf32, #tpu.memory_space<vmem>>, %arg4: memref<1x128xf32, #tpu.memory_space<vmem>>, %arg5: memref<128x128xbf16, #tpu.memory_space<vmem>>, %arg6: memref<1x128xf32, #tpu.memory_space<vmem>>, %arg7: memref<8x128xf32, #tpu.memory_space<vmem>>, %arg8: memref<8x128xbf16, #tpu.memory_space<vmem>>) attributes {dimension_semantics = [#tpu.dimension_semantics<parallel>, #tpu.dimension_semantics<arbitrary>], iteration_bounds = array<i64: 2, 1>, scalar_prefetch = 0 : i64, scratch_operands = 1 : i64, tpu.core_type = #tpu.core_type<tc>, window_params = [{transform_indices = @transform_0, window_bounds = array<i64: 8, 128>}, {pipeline_mode = #tpu.pipeline_mode<synchronous>, transform_indices = @transform_1, window_bounds = array<i64: 1, 128>}, {pipeline_mode = #tpu.pipeline_mode<synchronous>, transform_indices = @transform_2, window_bounds = array<i64: 1, 128>}, {pipeline_mode = #tpu.pipeline_mode<synchronous>, transform_indices = @transform_3, window_bounds = array<i64: 128, 128>}, {pipeline_mode = #tpu.pipeline_mode<synchronous>, transform_indices = @transform_4, window_bounds = array<i64: 1, 128>}, {transform_indices = @transform_5, window_bounds = array<i64: 8, 128>}]} {
    %c0_i32 = arith.constant 0 : i32
    %0 = arith.cmpi eq, %arg1, %c0_i32 : i32
    %1 = arith.extui %0 : i1 to i32
    %c0_i32_0 = arith.constant 0 : i32
    %2 = arith.cmpi ne, %1, %c0_i32_0 : i32
    scf.if %2 {
      %c0_8 = arith.constant 0 : index
      %c0_9 = arith.constant 0 : index
      %10 = vector.load %arg3[%c0_8, %c0_9] : memref<1x128xf32, #tpu.memory_space<vmem>>, vector<1x128xf32>
      %c0_10 = arith.constant 0 : index
      %c0_11 = arith.constant 0 : index
      %11 = vector.load %arg4[%c0_10, %c0_11] : memref<1x128xf32, #tpu.memory_space<vmem>>, vector<1x128xf32>
      %c0_12 = arith.constant 0 : index
      %c0_13 = arith.constant 0 : index
      %12 = vector.load %arg2[%c0_12, %c0_13] : memref<8x128xf32, #tpu.memory_space<vmem>>, vector<8x128xf32>
      %13 = tpu.iota {dimensions = array<i32: 1>} : vector<8x128xi32>
      %c32_i32 = arith.constant 32 : i32
      %14 = vector.broadcast %c32_i32 : i32 to vector<8x128xi32>
      %15 = arith.cmpi slt, %13, %14 : vector<8x128xi32>
      %cst_14 = arith.constant 0.000000e+00 : f32
      %16 = vector.broadcast %cst_14 : f32 to vector<8x128xf32>
      %17 = arith.select %15, %12, %16 : vector<8x128xi1>, vector<8x128xf32>
      %cst_15 = arith.constant dense<0.000000e+00> : vector<8xf32>
      %18 = vector.multi_reduction <add>, %17, %cst_15 [1] : vector<8x128xf32> to vector<8xf32>
      %19 = vector.shape_cast %18 : vector<8xf32> to vector<8x1xf32>
      %cst_16 = arith.constant 3.125000e-02 : f32
      %20 = vector.broadcast %cst_16 : f32 to vector<8x1xf32>
      %21 = arith.mulf %19, %20 : vector<8x1xf32>
      %22 = vector.broadcast %21 : vector<8x1xf32> to vector<8x128xf32>
      %23 = arith.subf %17, %22 : vector<8x128xf32>
      %cst_17 = arith.constant 0.000000e+00 : f32
      %24 = vector.broadcast %cst_17 : f32 to vector<8x128xf32>
      %25 = arith.select %15, %23, %24 : vector<8x128xi1>, vector<8x128xf32>
      %26 = arith.mulf %25, %25 : vector<8x128xf32>
      %cst_18 = arith.constant dense<0.000000e+00> : vector<8xf32>
      %27 = vector.multi_reduction <add>, %26, %cst_18 [1] : vector<8x128xf32> to vector<8xf32>
      %28 = vector.shape_cast %27 : vector<8xf32> to vector<8x1xf32>
      %cst_19 = arith.constant 3.125000e-02 : f32
      %29 = vector.broadcast %cst_19 : f32 to vector<8x1xf32>
      %30 = arith.mulf %28, %29 : vector<8x1xf32>
      %cst_20 = arith.constant 9.99999974E-6 : f32
      %31 = vector.broadcast %cst_20 : f32 to vector<8x1xf32>
      %32 = arith.addf %30, %31 : vector<8x1xf32>
      %33 = math.rsqrt %32 : vector<8x1xf32>
      %34 = vector.broadcast %33 : vector<8x1xf32> to vector<8x128xf32>
      %35 = arith.mulf %25, %34 : vector<8x128xf32>
      %36 = vector.broadcast %10 : vector<1x128xf32> to vector<8x128xf32>
      %37 = arith.mulf %35, %36 : vector<8x128xf32>
      %38 = vector.broadcast %11 : vector<1x128xf32> to vector<8x128xf32>
      %39 = arith.addf %37, %38 : vector<8x128xf32>
      %40 = arith.truncf %39 : vector<8x128xf32> to vector<8x128xbf16>
      %c0_21 = arith.constant 0 : index
      %c0_22 = arith.constant 0 : index
      %41 = vector.load %arg8[%c0_21, %c0_22] : memref<8x128xbf16, #tpu.memory_space<vmem>>, vector<8x128xbf16>
      tpu.vector_store %arg8[%c0_21, %c0_22], %40 {strides = array<i32>} : memref<8x128xbf16, #tpu.memory_space<vmem>>, vector<8x128xbf16>,
    } else {
    }
    %c0 = arith.constant 0 : index
    %c0_1 = arith.constant 0 : index
    %3 = vector.load %arg8[%c0, %c0_1] : memref<8x128xbf16, #tpu.memory_space<vmem>>, vector<8x128xbf16>
    %c0_2 = arith.constant 0 : index
    %c0_3 = arith.constant 0 : index
    %4 = vector.load %arg5[%c0_2, %c0_3] : memref<128x128xbf16, #tpu.memory_space<vmem>>, vector<128x128xbf16>
    %cst = arith.constant dense<0.000000e+00> : vector<8x128xf32>
    %5 = tpu.matmul %3, %4, %cst {dimension_numbers = #tpu.dot_dimension_numbers<[1], [0], [0], [1], [0, 0, 1, 1], [], []>} : vector<8x128xbf16>, vector<128x128xbf16>, vector<8x128xf32> -> vector<8x128xf32>
    %c0_4 = arith.constant 0 : index
    %c0_5 = arith.constant 0 : index
    %6 = vector.load %arg6[%c0_4, %c0_5] : memref<1x128xf32, #tpu.memory_space<vmem>>, vector<1x128xf32>
    %7 = vector.broadcast %6 : vector<1x128xf32> to vector<8x128xf32>
    %8 = arith.addf %5, %7 : vector<8x128xf32>
    %c0_6 = arith.constant 0 : index
    %c0_7 = arith.constant 0 : index
    %9 = vector.load %arg7[%c0_6, %c0_7] : memref<8x128xf32, #tpu.memory_space<vmem>>, vector<8x128xf32>
    tpu.vector_store %arg7[%c0_6, %c0_7], %8 {strides = array<i32>} : memref<8x128xf32, #tpu.memory_space<vmem>>, vector<8x128xf32>,
    return
  }
  func.func @transform_0(%arg0: i32, %arg1: i32) -> (i32, i32) {
    %c0_i32 = arith.constant 0 : i32
    %c0_i32_0 = arith.constant 0 : i32
    return %arg0, %c0_i32 : i32, i32
  }
  func.func @transform_1(%arg0: i32, %arg1: i32) -> (i32, i32) {
    %c0_i32 = arith.constant 0 : i32
    %c0_i32_0 = arith.constant 0 : i32
    %c0_i32_1 = arith.constant 0 : i32
    return %c0_i32, %c0_i32_0 : i32, i32
  }
  func.func @transform_2(%arg0: i32, %arg1: i32) -> (i32, i32) {
    %c0_i32 = arith.constant 0 : i32
    %c0_i32_0 = arith.constant 0 : i32
    %c0_i32_1 = arith.constant 0 : i32
    return %c0_i32, %c0_i32_0 : i32, i32
  }
  func.func @transform_3(%arg0: i32, %arg1: i32) -> (i32, i32) {
    %c0_i32 = arith.constant 0 : i32
    %c0_i32_0 = arith.constant 0 : i32
    %c0_i32_1 = arith.constant 0 : i32
    return %c0_i32, %c0_i32_0 : i32, i32
  }
  func.func @transform_4(%arg0: i32, %arg1: i32) -> (i32, i32) {
    %c0_i32 = arith.constant 0 : i32
    %c0_i32_0 = arith.constant 0 : i32
    %c0_i32_1 = arith.constant 0 : i32
    return %c0_i32, %c0_i32_0 : i32, i32
  }
  func.func @transform_5(%arg0: i32, %arg1: i32) -> (i32, i32) {
    %c0_i32 = arith.constant 0 : i32
    %c0_i32_0 = arith.constant 0 : i32
    return %arg0, %c0_i32 : i32, i32
  }
}

</mosaic_0001>

<bundles_post_ra>
// kernel: tpu_custom_call.1
= control target key start
LH: loop header
LB: loop body
LE: loop exit
PB: predicated region body
PF: predicated region fallthrough
CT: control target
= control target key end

     0   :  { %10 = vsyncpa [#allocation4], 0  ;;  %s1074_s0 = inlined_call_operand.hbm [shape: f32[16,128], index: 0, kind: input, shape index: {}]   ;;  %s1075_s1 = inlined_call_operand.vmem [shape: f32[1,128], index: 1, kind: input, shape index: {}]   ;;  %s1076_s2 = inlined_call_operand.vmem [shape: f32[1,128], index: 2, kind: input, shape index: {}]   ;;  %s1077_s3 = inlined_call_operand.hbm [shape: bf16[128,128], index: 3, kind: input, shape index: {}]   ;;  %s1078_s4 = inlined_call_operand.vmem [shape: f32[1,128], index: 4, kind: input, shape index: {}]   ;;  %s1079_s5 = inlined_call_operand.hbm [shape: f32[16,128], index: 5, kind: output, shape index: {}]  }
   0x1   :  { %12 = vsyncpa [#allocation4 + $0x1], 0 }
   0x2   :  { %13 = vsyncpa [#allocation7], 0 }
   0x3   :  { %14 = vsyncpa [#allocation5], 0 }
   0x4   :  { %16 = vsyncpa [#allocation5 + $0x1], 0  ;;  %s847_s18 = smov 0   ;;  %s849_s19 = smov 0  }
   0x5   :  { %s851_s20 = smov 0   ;;  %s853_s21 = smov 0  }
   0x6   :  { %s855_s22 = smov 0   ;;  %s857_s23 = smov 0  }
   0x7 LB: > { %s522_s24 = sadd.s32 4294967295, %s808_s23   ;;  %s523_s25 = sadd.s32 4294967294, %s808_s23   ;;  %s808_s23 = sphi %s857_s23, %s22_s23   ;;  %s804_s22 = sphi %s855_s22, %s1103_s22   ;;  %s800_s21 = sphi %s853_s21, %s1102_s21   ;;  %s796_s20 = sphi %s851_s20, %s1101_s20   ;;  %s792_s19 = sphi %s849_s19, %s1100_s19   ;;  %s788_s18 = sphi %s847_s18, %s1099_s18  }
   0x8   : > { %p54_p0 = scmp.ne.s32.totalorder %s792_s19, %s788_s18  ;;  %p881_p1 = scmp.eq.s32.totalorder %s522_s24, 0 }
   0x9   : > { %p885_p2 = scmp.eq.s32.totalorder %s522_s24, 1  ;;  %p168_p3 = scmp.eq.s32.totalorder %s523_s25, 1 }
   0xa   : > { %s1084_s26 = scalar_select %p881_p1, 1, 0 }
   0xb   : > { %s1085_s27 = scalar_select %p885_p2, 1, 0 }
   0xc   : > { %p891_p4 = por %p881_p1, %p54_p0  ;;  %p524_p5 = scmp.ge.s32.totalorder %s808_s23, 1 }
   0xd   : > { %p896_p6 = por %p168_p3, %p54_p0  ;;  %p175_p7 = scmp.lt.s32.totalorder %s808_s23, 3 }
   0xe   : > { %s1086_s28 = scalar_select %p891_p4, 1, 0 }
   0xf   : > { %s1087_s29 = scalar_select %p896_p6, 1, 0 }
  0x10   : > { %p901_p8 = pnand %p524_p5, %p175_p7  ;;  %s810_s6 = smov [#allocation6]  }
  0x11   : > { %s193_s7 = sshll.u32 %s810_s6, 4  ;;  %s34_s9 = sadd.s32 1, %s804_s22  ;;  %s194_s7 = int_to_ptr.vmem [resolvable:$true] %s193_s7 }
  0x12   : > { %s1088_s30 = scalar_select %p901_p8, 1, 0 }
  0x13   : > { %p585_p9 = pneg %p901_p8  ;;  %s664_s12 = scalar_lea.hbm %s1077_s3, 1024 }
  0x14   : > { %p665_p12 = scmp.ne.s32.totalorder %s1077_s3, %s664_s12  ;;  %p671_p5 = scmp.lt.u32.totalorder %s664_s12, %s1077_s3 }
  0x15   : > { %p910_p11 = pnand %p585_p9, %p881_p1 }
  0x17   : > { %p666_p13 = pneg %p910_p11 }
  0x19   : > { %p667_p0 = pnand %p666_p13, %p665_p12 }
  0x1b   : > { %p668_p3 = pneg %p667_p0 }
  0x1d   : > { %p673_p7 = pnand %p671_p5, %p668_p3 }
  0x1f   : > { %676 = shalt.err (!%p673_p7)
}
  0x20   : > { %s677_s17 = scalar_lea.vmem %s194_s7, 1024  ;;  %p685_p1 = scmp.lt.s32.totalorder %s194_s7, %s194_s7 }
  0x21   : > { %p678_p9 = scmp.ne.s32.totalorder %s194_s7, %s677_s17  ;;  %p686_p4 = scmp.lt.s32.totalorder %s677_s17, %s677_s17 }
  0x23   : > { %p680_p10 = pnand %p678_p9, %p666_p13  ;;  %p687_p8 = por %p686_p4, %p685_p1 }
  0x25   : > { %p681_p6 = pneg %p680_p10 }
  0x27   : > { %p688_p2 = pnand %p687_p8, %p681_p6 }
  0x29   : > { %691 = shalt.err (!%p688_p2)
}
  0x2a   : > { %s811_s24 = smov 64   ;;  %s812_s25 = smov 4  }
  0x2b   : > { %588 = dma.hbm_to_vmem [thread:$0]  (!%p910_p11), %s1077_s3, 1024, %s194_s7, [#allocation7], %s811_s24, %s811_s24, %s812_s25  }
  0x2c   : > { %p36_p1 = scmp.ge.s32.totalorder %s34_s9, 2  ;;  %s41_s11 = sadd.s32 1, %s796_s20 }
  0x2d   : > { %p48_p2 = scmp.ne.s32.totalorder %s796_s20, %s792_s19  ;;  %p49_p4 = scmp.eq.s32.totalorder %s808_s23, 0 }
  0x2e   : > { %s1105_s9 = smov (%p36_p1, %s34_s9), 0  ;;  %p1091_p8 = scmp.ne.s32.totalorder %s1085_s27, 0 }
  0x2f   : > { %p937_p6 = por %p49_p4, %p48_p2  ;;  %s38_s8 = ssub.s32 %s804_s22, %s1105_s9 }
  0x30   : > { %p943_p10 = por %p1091_p8, %p48_p2  ;;  %p598_p12 = scmp.lt.s32.totalorder %s808_s23, 2 }
  0x31   : > { %p39_p11 = scmp.eq.s32.totalorder %s38_s8, 0  ;;  %s210_s7 = sand.u32 1, %s796_s20  }
  0x32   : > { %s527_s14 = sshll.u32 %s210_s7, 3  ;;  %s528_s16 = sshll.u32 %s804_s22, 7 }
  0x33   : > { %s952_s15 = scalar_select %p39_p11, %s796_s20, %s41_s11  }
  0x34   : > { %s958_s25 = scalar_lea.hbm %s1074_s0, %s528_s16  ;;  %s214_s27 = scalar_lea.vmem [#allocation3], %s527_s14 }
  0x35   : > { %s221_s6 = sshll.u32 %s214_s27, 4  ;;  %p964_p13 = pnand %p598_p12, %p937_p6  ;;  %s960_s6 = int_to_ptr.vmem [resolvable:$true] %s221_s6 }
  0x36   : > { %s211_s11 = scalar_lea.sflag [#allocation4], %s210_s7  ;;  %s692_s8 = scalar_lea.hbm %s958_s25, 128 }
  0x37   : > { %p693_p0 = scmp.ne.s32.totalorder %s958_s25, %s692_s8  ;;  %p694_p3 = pneg %p964_p13 }
  0x38   : > { %s697_s17 = scalar_lea.hbm %s1074_s0, 256  ;;  %p698_p9 = scmp.lt.u32.totalorder %s958_s25, %s1074_s0 }
  0x39   : > { %p695_p5 = pnand %p694_p3, %p693_p0  ;;  %p699_p1 = scmp.lt.u32.totalorder %s697_s17, %s692_s8 }
  0x3a   : > { %p701_p4 = scmp.lt.u32.totalorder %s692_s8, %s958_s25 }
  0x3b   : > { %p696_p7 = pneg %p695_p5  ;;  %p700_p2 = por %p699_p1, %p698_p9 }
  0x3d   : > { %p702_p6 = por %p701_p4, %p700_p2 }
  0x3f   : > { %p703_p8 = pnand %p702_p6, %p696_p7 }
  0x41   : > { %706 = shalt.err (!%p703_p8)
}
  0x42   : > { %s707_s7 = scalar_lea.vmem %s960_s6, 128  ;;  %s813_s27 = smov [#allocation3]  }
  0x43   : > { %p708_p12 = scmp.ne.s32.totalorder %s960_s6, %s707_s7  ;;  %s712_s14 = sshll.u32 %s813_s27, 4  ;;  %s713_s14 = int_to_ptr.vmem [resolvable:$false] %s712_s14 }
  0x44   : > { %s714_s16 = scalar_lea.vmem %s713_s14, 256  ;;  %p715_p5 = scmp.lt.s32.totalorder %s960_s6, %s713_s14 }
  0x45   : > { %p710_p11 = pnand %p708_p12, %p694_p3  ;;  %p716_p9 = scmp.lt.s32.totalorder %s714_s16, %s707_s7 }
  0x47   : > { %p711_p0 = pneg %p710_p11  ;;  %p717_p1 = por %p716_p9, %p715_p5 }
  0x49   : > { %p718_p2 = pnand %p717_p1, %p711_p0 }
  0x4b   : > { %721 = shalt.err (!%p718_p2)
}
  0x4c   : > { %592 = dma.hbm_to_vmem [thread:$0]  (!%p964_p13), %s958_s25, 128, %s960_s6, %s211_s11  }
  0x4d   : > { %p1094_p7 = scmp.ne.s32.totalorder %s1088_s30, 0 }
  0x4e   : > { %s996_s8 = sand.u32 (!%p1094_p7), 1, %s792_s19   ;;  %p1095_p3 = scmp.ne.s32.totalorder (!%p1094_p7), %s1086_s28, 0 }
  0x4f   : > { %230 = sbr.rel (%p1094_p7) target bundleno = 646 (0x286), region = 40  ;;  %s530_s17 = sshll.u32 (!%p1094_p7), %s996_s8, 3 }
  0x50   : > { %s233_s12 = scalar_lea.sflag (!%p1094_p7), [#allocation4], %s996_s8  ;;  %s236_s24 = scalar_lea.vmem (!%p1094_p7), [#allocation3], %s530_s17 }
  0x56   : > { %775 = dma.done.wait (%p1095_p3), %s233_s12, 128  }
  0x57   : > { %777 = vsyncadd (%p1095_p3), %s233_s12, 4294967168  ;;  %p1096_p13 = scmp.ne.s32.totalorder %s1084_s26, 0 }
  0x59   : > { %779 = dma.done.wait (%p1096_p13), [#allocation7], 1024  }
  0x5a   : > { %781 = vsyncadd (%p1096_p13), [#allocation7], 4294966272  ;;  %v275_v0 = vlaneseq  ;;  %v274_v2 = vld [vmem:[%s236_s24] sm:$0xff]  ;;  %v814_v4 = vmov 0.0   ;;  %v654_v10 = vld [vmem:[#allocation6] sm:$0xff]   ;;  %vm815_vm1 = vmmov 0  }
  0x5b   : > { %557 = vmatprep.subr.bf16.mxu0 %v814_v4  ;;  %v655_v11 = vld [vmem:[#allocation6 + $0x8] sm:$0xff]   ;;  %v656_v12 = vld [vmem:[#allocation6 + $0x10] sm:$0xff]   ;;  %v657_v13 = vld [vmem:[#allocation6 + $0x18] sm:$0xff]   ;;  %573 = vmatprep.mubr.msk.bf16.mxu0 %vm815_vm1, %v814_v4  ;;  %s545_s11 = sshll.u32 %s800_s21, 7  ;;  %s266_s7 = scalar_lea.vmem [#allocation8], %s530_s17 }
  0x5c   : > { %v276_v1 = vand.u32 127, %v275_v0  ;;  %558 = vmatpush3.bf16.msra.mxu0 %v654_v10  ;;  %v658_v14 = vld [vmem:[#allocation6 + $0x20] sm:$0xff]   ;;  %v659_v15 = vld [vmem:[#allocation6 + $0x28] sm:$0xff]   ;;  %v660_v16 = vld [vmem:[#allocation6 + $0x30] sm:$0xff]   ;;  %s434_s27 = sshll.u32 %s266_s7, 4  ;;  %s1025_s12 = scalar_lea.hbm %s1079_s5, %s545_s11  ;;  %s1027_s27 = int_to_ptr.vmem [resolvable:$true] %s434_s27 }
  0x5d   : > { %559 = vmatprep.subr.bf16.mxu0 %v814_v4  ;;  %v661_v17 = vld [vmem:[#allocation6 + $0x38] sm:$0xff]   ;;  %v533_v22 = vld [vmem:[%s1075_s1] ss:$0 sm:$0xff]  ;;  %s421_s21 = scalar_lea.sflag [#allocation5], %s996_s8  ;;  %s722_s24 = scalar_lea.vmem %s1027_s27, 128 }
  0x5e   : > { %vm277_vm0 = vcmp.lt.s32.totalorder %v276_v1, 32  ;;  %v534_v24 = vld [vmem:[%s1076_s2] ss:$0 sm:$0xff]  ;;  %p723_p4 = scmp.ne.s32.totalorder %s1027_s27, %s722_s24  ;;  %s816_s17 = smov [#allocation8]  }
  0x5f   : > { %v278_v3 = vsel %vm277_vm0, %v274_v2, 0.0  ;;  %v535_v29 = vld [vmem:[%s1078_s4] ss:$0 sm:$0xff]  ;;  %s726_s26 = sshll.u32 %s816_s17, 4  ;;  %s727_s26 = int_to_ptr.vmem [resolvable:$false] %s726_s26 }
  0x60   : > { %279 = vadd.xlane.f32.xlu0 %v278_v3  ;;  %560 = vmatpush3.bf16.msra.mxu0 %v655_v11  ;;  %p724_p6 = pnand %p723_p4, %p943_p10  ;;  %s728_s28 = scalar_lea.vmem %s727_s26, 256 }
  0x61   : > { %561 = vmatprep.subr.bf16.mxu0 %v814_v4  ;;  %p729_p12 = scmp.lt.s32.totalorder %s1027_s27, %s727_s26  ;;  %p730_p11 = scmp.lt.s32.totalorder %s728_s28, %s722_s24 }
  0x62   : > { %p725_p8 = pneg %p724_p6 }
  0x63   : > { %p731_p0 = por %p730_p11, %p729_p12 }
  0x64   : > { %562 = vmatpush3.bf16.msra.mxu0 %v656_v12 }
  0x65   : > { %563 = vmatprep.subr.bf16.mxu0 %v814_v4  ;;  %p732_p5 = pnand %p731_p0, %p725_p8 }
  0x68   : > { %564 = vmatpush3.bf16.msra.mxu0 %v657_v13 }
  0x69   : > { %565 = vmatprep.subr.bf16.mxu0 %v814_v4 }
  0x6c   : > { %566 = vmatpush3.bf16.msra.mxu0 %v658_v14 }
  0x6d   : > { %567 = vmatprep.subr.bf16.mxu0 %v814_v4 }
  0x70   : > { %568 = vmatpush3.bf16.msra.mxu0 %v659_v15 }
  0x71   : > { %569 = vmatprep.subr.bf16.mxu0 %v814_v4 }
  0x74   : > { %570 = vmatpush3.bf16.msra.mxu0 %v660_v16 }
  0x75   : > { %571 = vmatprep.subr.bf16.mxu0 %v814_v4 }
  0x78   : > { %572 = vmatpush3.bf16.msra.mxu0 %v661_v17 }
  0xed   : > { %v280_v5 = vpop.xlane.xlu0 %279 }
  0xee   : > { %v281_v6 = vmul.f32 0.03125, %v280_v5 }
  0xf0   : > { %v282_v7 = vsub.f32 %v278_v3, %v281_v6 }
  0xf2   : > { %v283_v8 = vsel %vm277_vm0, %v282_v7, 0.0 }
  0xf3   : > { %v284_v9 = vmul.f32 %v283_v8, %v283_v8 }
  0xf5   : > { %285 = vadd.xlane.f32.xlu0 %v284_v9 }
 0x182   : > { %v286_v18 = vpop.xlane.xlu0 %285 }
 0x183   : > { %v287_v19 = vmul.f32 0.03125, %v286_v18 }
 0x185   : > { %v288_v20 = vadd.f32 1e-05, %v287_v19 }
 0x187   : > { %662 = vrsqrt.f32 %v288_v20 }
 0x191   : > { %v663_v21 = vpop.eup %662 }
 0x192   : > { %v290_v23 = vmul.f32 %v663_v21, %v283_v8 }
 0x194   : > { %v297_v25 = vmul.f32 %v533_v22, %v290_v23 }
 0x196   : > { %v304_v26 = vadd.f32 %v534_v24, %v297_v25 }
 0x198   : > { %v305_v27 = vpack.c.bf16 %v304_v26, %v304_v26 }
 0x19a   : > { %306 = vst [vmem:[#allocation2] sm:$0xf] %v305_v27 }
 0x1a1   : > { %v307_v28 = vld [vmem:[#allocation2] sm:$0xf] }
 0x1a2   : > { %574 = vmatmul.mubr.bf16.vlgmr.msra.gmra.mrb[0].mxu0 %v307_v28 }
 0x275   : > { %v413_v30 = vpop.f32.mrb[0].mxu0 }
 0x276   : > { %v414_v31 = vadd.f32 %v535_v29, %v413_v30  ;;  %v575_v32 = vpop.f32.mrb[1].mxu0 }
 0x277   : > { %v416_v33 = vpop.f32.mrb[2].mxu0 }
 0x278   : > { %419 = vst [vmem:[%s266_s7] sm:$0xff] %v414_v31  ;;  %v576_v34 = vpop.f32.mrb[3].mxu0 }
 0x279   : > { %735 = shalt.err (!%p732_p5)
}
 0x27a   : > { %s736_s8 = scalar_lea.hbm %s1025_s12, 128  ;;  %s740_s6 = scalar_lea.hbm %s1079_s5, 256 }
 0x27b   : > { %p737_p9 = scmp.ne.s32.totalorder %s1025_s12, %s736_s8  ;;  %p741_p7 = scmp.lt.u32.totalorder %s1025_s12, %s1079_s5 }
 0x27c   : > { %p742_p3 = scmp.lt.u32.totalorder %s740_s6, %s736_s8  ;;  %p744_p4 = scmp.lt.u32.totalorder %s736_s8, %s1025_s12 }
 0x27d   : > { %p738_p1 = pnand %p737_p9, %p943_p10 }
 0x27e   : > { %p743_p13 = por %p742_p3, %p741_p7 }
 0x27f   : > { %p739_p2 = pneg %p738_p1 }
 0x280   : > { %p745_p6 = por %p744_p4, %p743_p13 }
 0x282   : > { %p746_p8 = pnand %p745_p6, %p739_p2 }
 0x284   : > { %749 = shalt.err (!%p746_p8)
}
 0x285   : > { %583 = dma.vmem_to_hbm [thread:$0]  (%p943_p10), %s1027_s27, 128, %s1025_s12, %s421_s21  }
 0x286 PF: > { %s446_s7 = sand.u32 1, %s788_s18   ;;  %p1097_p12 = scmp.ne.s32.totalorder %s1087_s29, 0 }
 0x287   : > { %p1098_p11 = scmp.ge.s32.totalorder %s808_s23, 2  ;;  %s447_s14 = scalar_lea.sflag [#allocation5], %s446_s7 }
 0x289   : > { %p594_p0 = pnand %p1098_p11, %p1097_p12 }
 0x28b   : > { %783 = dma.done.wait (!%p594_p0), %s447_s14, 128  }
 0x28c   : > { %785 = vsyncadd (!%p594_p0), %s447_s14, 4294967168  ;;  %s22_s23 = sadd.s32 1, %s808_s23   ;;  %s1099_s18 = smov %s792_s19 }
 0x28d   : > { %p19_p5 = scmp.ge.s32.totalorder %s22_s23, 4   ;;  %s1100_s19 = smov %s796_s20 }
 0x28e   : > { %s1101_s20 = smov %s952_s15  ;;  %s1102_s21 = smov %s804_s22 }
 0x28f   : > { %s1103_s22 = smov %s1105_s9  ;;  %21 = sbr.rel (!%p19_p5) target bundleno = 7 (0x7), region = 93 }
 0x296   :  { %452 = vsyncpa [#allocation4], 1 }
 0x297   :  { %454 = vsyncpa [#allocation4 + $0x1], 1 }
 0x298   :  { %455 = vsyncpa [#allocation7], 1 }
 0x299   :  { %456 = vsyncpa [#allocation5], 1 }
 0x29a   :  { %458 = vsyncpa [#allocation5 + $0x1], 1 }

</bundles_post_ra>
